<compile_context>
chip_gen: v6e
topology: v6e:2x2x1
jax: 0.10.0
libtpu: 0.0.40
codegen_flags: <defaults>
</compile_context>

<pallas_src>
import functools

import jax
import jax.numpy as jnp
from jax.experimental import pallas as pl
from jax.experimental.pallas import tpu as pltpu


OUT_PAD = 128  # final layer padded from 3 -> 128 lanes for lane-dense stores


def _round_up(a, m):
    return ((a + m - 1) // m) * m


def deepnn_kernel(
    x_ref,
    w1_ref, c1_ref,
    w2_ref, c2_ref,
    w3_ref, c3_ref,
    w4_ref, c4_ref,
    w5_ref, c5_ref,
    out_ref,
):
    """Fused MLP forward: 4 x (Linear+BN folded -> ReLU) -> Linear (padded)."""
    h = x_ref[...]  # (TB, 4) float32

    def layer(h, w_ref, c_ref):
        # bf16 operands into the MXU, f32 accumulation; bias/ReLU in f32.
        z = jnp.dot(h.astype(jnp.bfloat16), w_ref[...],
                    preferred_element_type=jnp.float32)
        return jnp.maximum(z + c_ref[...], 0.0)
        # TODO(synk): training-mode Dropout(0.5) intentionally omitted
        # (eval-mode identity); could be added with pltpu.prng_random_bits.

    h = layer(h, w1_ref, c1_ref)
    h = layer(h, w2_ref, c2_ref)
    h = layer(h, w3_ref, c3_ref)
    h = layer(h, w4_ref, c4_ref)

    out = jnp.dot(h.astype(jnp.bfloat16), w5_ref[...],
                  preferred_element_type=jnp.float32) + c5_ref[...]
    out_ref[...] = out.astype(out_ref.dtype)  # (TB, 128) lane-dense store


def deepnn_forward(x, kparams, *, block_batch=None):
    """x: (B, 4) float32 -> (B, 3) float32."""
    B, D_in = x.shape

    # Pick a batch tile: multiple of 8 (f32 sublane), capped at 512 so the
    # activation tiles comfortably fit VMEM on v5e/v6e/v7x.
    if block_batch is None:
        TB = min(512, _round_up(max(B, 8), 8))
    else:
        TB = block_batch
    B_pad = _round_up(B, TB)
    if B_pad != B:
        x = jnp.pad(x, ((0, B_pad - B), (0, 0)))

    ws = kparams["w"]  # 5 bf16 weights, (in, out); last one padded to (128, 128)
    cs = kparams["c"]  # 5 f32 folded biases, (1, out); last padded to (1, 128)

    operands = [x]
    in_specs = [pl.BlockSpec((TB, D_in), lambda i: (i, 0))]
    for w, c in zip(ws, cs):
        operands.append(w)
        in_specs.append(pl.BlockSpec(w.shape, lambda i: (0, 0)))  # VMEM-resident
        operands.append(c)
        in_specs.append(pl.BlockSpec(c.shape, lambda i: (0, 0)))

    out = pl.pallas_call(
        deepnn_kernel,
        out_shape=jax.ShapeDtypeStruct((B_pad, OUT_PAD), jnp.float32),
        grid=(B_pad // TB,),
        in_specs=in_specs,
        out_specs=pl.BlockSpec((TB, OUT_PAD), lambda i: (i, 0)),
        compiler_params=pltpu.CompilerParams(
            dimension_semantics=("parallel",),
        ),
    )(*operands)
    return out[:B, :3]


def make_raw_params(key):
    """Deterministic synthetic parameters matching DeepNN.__init__ shapes
    (PyTorch layout emulated: Linear weight is (out, in), BN eval stats)."""
    dims = [(4, 512), (512, 512), (512, 256), (256, 128)]
    eps = 1e-5
    hidden = []
    for (d_in, d_out) in dims:
        key, kw, kb, kg, kbe, km, kv = jax.random.split(key, 7)
        w = jax.random.normal(kw, (d_out, d_in), jnp.float32) * (1.0 / jnp.sqrt(d_in))
        b = jax.random.normal(kb, (d_out,), jnp.float32) * 0.1
        gamma = 1.0 + 0.1 * jax.random.normal(kg, (d_out,), jnp.float32)
        beta = 0.1 * jax.random.normal(kbe, (d_out,), jnp.float32)
        run_mean = 0.1 * jax.random.normal(km, (d_out,), jnp.float32)
        run_var = 1.0 + 0.1 * jax.random.uniform(kv, (d_out,), jnp.float32)
        hidden.append(dict(w=w, b=b, gamma=gamma, beta=beta,
                           mean=run_mean, var=run_var, eps=eps))
    key, kw5, kb5 = jax.random.split(key, 3)
    w5 = jax.random.normal(kw5, (3, 128), jnp.float32) * (1.0 / jnp.sqrt(128.0))
    b5 = jax.random.normal(kb5, (3,), jnp.float32) * 0.1
    return {"hidden": hidden, "final": (w5, b5)}


def fold_params(raw):
    """Fold Linear bias + BN(eval) affine into the weights and cast to bf16.

    Hidden layer:   y = relu((x @ W^T + b) * scale + shift)
                      = relu(x @ (W^T * scale) + (b * scale + shift))
    scale broadcasts over the out-feature (column) axis of the (in, out) weight.
    """
    ws, cs = [], []
    for p in raw["hidden"]:
        scale = p["gamma"] / jnp.sqrt(p["var"] + p["eps"])            # (out,)
        shift = p["beta"] - p["mean"] * scale                          # (out,)
        w_t = p["w"].T                                                 # (in, out)
        w_folded = w_t * scale[None, :]                                # column bcast
        c_folded = p["b"] * scale + shift                              # (out,)
        ws.append(w_folded.astype(jnp.bfloat16))
        cs.append(c_folded[None, :].astype(jnp.float32))
    w5, b5 = raw["final"]
    w5_t = w5.T                                                        # (128, 3)
    w5_pad = jnp.zeros((128, OUT_PAD), jnp.float32).at[:, :3].set(w5_t)
    c5_pad = jnp.zeros((1, OUT_PAD), jnp.float32).at[0, :3].set(b5)
    ws.append(w5_pad.astype(jnp.bfloat16))
    cs.append(c5_pad)
    return {"w": ws, "c": cs}


def reference_forward(x, kparams):
    """Pure-JAX reference of the same folded / bf16-weight forward."""
    h = x
    ws, cs = kparams["w"], kparams["c"]
    for w, c in zip(ws[:-1], cs[:-1]):
        z = jnp.dot(h.astype(jnp.bfloat16), w,
                    preferred_element_type=jnp.float32) + c
        h = jnp.maximum(z, 0.0)
    out = jnp.dot(h.astype(jnp.bfloat16), ws[-1],
                  preferred_element_type=jnp.float32) + cs[-1]
    return out[:, :3]


def reference_forward_f32(x, raw):
    """Full-precision eval-mode reference of the original PyTorch module."""
    h = x
    for p in raw["hidden"]:
        z = h @ p["w"].T + p["b"]
        z = (z - p["mean"]) / jnp.sqrt(p["var"] + p["eps"]) * p["gamma"] + p["beta"]
        h = jnp.maximum(z, 0.0)
    w5, b5 = raw["final"]
    return h @ w5.T + b5


if __name__ == "__main__":
    key = jax.random.PRNGKey(0)
    key, kx = jax.random.split(key)
    B = 8
    x = jax.random.normal(kx, (B, 4), jnp.float32)

    raw = make_raw_params(key)
    kparams = fold_params(raw)

    out = deepnn_forward(x, kparams)
    out = jax.block_until_ready(out)

    assert out.shape == (B, 3)

    # Tight check vs a JAX reference doing the same bf16-weight computation.
    ref_bf16 = reference_forward(x, kparams)
    assert jnp.allclose(out, ref_bf16, atol=1e-2, rtol=1e-2), \
        "mismatch vs bf16-weight JAX reference"

    # Loose check vs the full-f32 eval-mode PyTorch-equivalent forward
    # (bf16 weight quantization introduces small deviations).
    ref_f32 = reference_forward_f32(x, raw)
    assert jnp.allclose(out, ref_f32, atol=1e-1, rtol=5e-2), \
        "mismatch vs f32 reference beyond bf16 tolerance"

    print("KERNEL_OK")
</pallas_src>

<mosaic_0001>
module attributes {stable_mosaic.version = 11 : i64} {
  func.func @deepnn_kernel(%arg0: i32, %arg1: memref<8x4xf32, #tpu.memory_space<vmem>>, %arg2: memref<4x512xbf16, #tpu.memory_space<vmem>>, %arg3: memref<1x512xf32, #tpu.memory_space<vmem>>, %arg4: memref<512x512xbf16, #tpu.memory_space<vmem>>, %arg5: memref<1x512xf32, #tpu.memory_space<vmem>>, %arg6: memref<512x256xbf16, #tpu.memory_space<vmem>>, %arg7: memref<1x256xf32, #tpu.memory_space<vmem>>, %arg8: memref<256x128xbf16, #tpu.memory_space<vmem>>, %arg9: memref<1x128xf32, #tpu.memory_space<vmem>>, %arg10: memref<128x128xbf16, #tpu.memory_space<vmem>>, %arg11: memref<1x128xf32, #tpu.memory_space<vmem>>, %arg12: memref<8x128xf32, #tpu.memory_space<vmem>>) attributes {dimension_semantics = [#tpu.dimension_semantics<parallel>], iteration_bounds = array<i64: 1>, scalar_prefetch = 0 : i64, scratch_operands = 0 : i64, tpu.core_type = #tpu.core_type<tc>, window_params = [{transform_indices = @transform_0, window_bounds = array<i64: 8, 4>}, {pipeline_mode = #tpu.pipeline_mode<synchronous>, transform_indices = @transform_1, window_bounds = array<i64: 4, 512>}, {pipeline_mode = #tpu.pipeline_mode<synchronous>, transform_indices = @transform_2, window_bounds = array<i64: 1, 512>}, {pipeline_mode = #tpu.pipeline_mode<synchronous>, transform_indices = @transform_3, window_bounds = array<i64: 512, 512>}, {pipeline_mode = #tpu.pipeline_mode<synchronous>, transform_indices = @transform_4, window_bounds = array<i64: 1, 512>}, {pipeline_mode = #tpu.pipeline_mode<synchronous>, transform_indices = @transform_5, window_bounds = array<i64: 512, 256>}, {pipeline_mode = #tpu.pipeline_mode<synchronous>, transform_indices = @transform_6, window_bounds = array<i64: 1, 256>}, {pipeline_mode = #tpu.pipeline_mode<synchronous>, transform_indices = @transform_7, window_bounds = array<i64: 256, 128>}, {pipeline_mode = #tpu.pipeline_mode<synchronous>, transform_indices = @transform_8, window_bounds = array<i64: 1, 128>}, {pipeline_mode = #tpu.pipeline_mode<synchronous>, transform_indices = @transform_9, window_bounds = array<i64: 128, 128>}, {pipeline_mode = #tpu.pipeline_mode<synchronous>, transform_indices = @transform_10, window_bounds = array<i64: 1, 128>}, {transform_indices = @transform_11, window_bounds = array<i64: 8, 128>}]} {
    %c0 = arith.constant 0 : index
    %c0_0 = arith.constant 0 : index
    %0 = vector.load %arg1[%c0, %c0_0] : memref<8x4xf32, #tpu.memory_space<vmem>>, vector<8x4xf32>
    %1 = arith.truncf %0 : vector<8x4xf32> to vector<8x4xbf16>
    %c0_1 = arith.constant 0 : index
    %c0_2 = arith.constant 0 : index
    %2 = vector.load %arg2[%c0_1, %c0_2] : memref<4x512xbf16, #tpu.memory_space<vmem>>, vector<4x512xbf16>
    %cst = arith.constant dense<0.000000e+00> : vector<8x512xf32>
    %3 = tpu.matmul %1, %2, %cst {dimension_numbers = #tpu.dot_dimension_numbers<[1], [0], [0], [1], [0, 0, 1, 1], [], []>} : vector<8x4xbf16>, vector<4x512xbf16>, vector<8x512xf32> -> vector<8x512xf32>
    %c0_3 = arith.constant 0 : index
    %c0_4 = arith.constant 0 : index
    %4 = vector.load %arg3[%c0_3, %c0_4] : memref<1x512xf32, #tpu.memory_space<vmem>>, vector<1x512xf32>
    %5 = vector.broadcast %4 : vector<1x512xf32> to vector<8x512xf32>
    %6 = arith.addf %3, %5 : vector<8x512xf32>
    %cst_5 = arith.constant 0.000000e+00 : f32
    %7 = vector.broadcast %cst_5 : f32 to vector<8x512xf32>
    %8 = arith.maximumf %6, %7 : vector<8x512xf32>
    %9 = arith.truncf %8 : vector<8x512xf32> to vector<8x512xbf16>
    %c0_6 = arith.constant 0 : index
    %c0_7 = arith.constant 0 : index
    %10 = vector.load %arg4[%c0_6, %c0_7] : memref<512x512xbf16, #tpu.memory_space<vmem>>, vector<512x512xbf16>
    %cst_8 = arith.constant dense<0.000000e+00> : vector<8x512xf32>
    %11 = tpu.matmul %9, %10, %cst_8 {dimension_numbers = #tpu.dot_dimension_numbers<[1], [0], [0], [1], [0, 0, 1, 1], [], []>} : vector<8x512xbf16>, vector<512x512xbf16>, vector<8x512xf32> -> vector<8x512xf32>
    %c0_9 = arith.constant 0 : index
    %c0_10 = arith.constant 0 : index
    %12 = vector.load %arg5[%c0_9, %c0_10] : memref<1x512xf32, #tpu.memory_space<vmem>>, vector<1x512xf32>
    %13 = vector.broadcast %12 : vector<1x512xf32> to vector<8x512xf32>
    %14 = arith.addf %11, %13 : vector<8x512xf32>
    %cst_11 = arith.constant 0.000000e+00 : f32
    %15 = vector.broadcast %cst_11 : f32 to vector<8x512xf32>
    %16 = arith.maximumf %14, %15 : vector<8x512xf32>
    %17 = arith.truncf %16 : vector<8x512xf32> to vector<8x512xbf16>
    %c0_12 = arith.constant 0 : index
    %c0_13 = arith.constant 0 : index
    %18 = vector.load %arg6[%c0_12, %c0_13] : memref<512x256xbf16, #tpu.memory_space<vmem>>, vector<512x256xbf16>
    %cst_14 = arith.constant dense<0.000000e+00> : vector<8x256xf32>
    %19 = tpu.matmul %17, %18, %cst_14 {dimension_numbers = #tpu.dot_dimension_numbers<[1], [0], [0], [1], [0, 0, 1, 1], [], []>} : vector<8x512xbf16>, vector<512x256xbf16>, vector<8x256xf32> -> vector<8x256xf32>
    %c0_15 = arith.constant 0 : index
    %c0_16 = arith.constant 0 : index
    %20 = vector.load %arg7[%c0_15, %c0_16] : memref<1x256xf32, #tpu.memory_space<vmem>>, vector<1x256xf32>
    %21 = vector.broadcast %20 : vector<1x256xf32> to vector<8x256xf32>
    %22 = arith.addf %19, %21 : vector<8x256xf32>
    %cst_17 = arith.constant 0.000000e+00 : f32
    %23 = vector.broadcast %cst_17 : f32 to vector<8x256xf32>
    %24 = arith.maximumf %22, %23 : vector<8x256xf32>
    %25 = arith.truncf %24 : vector<8x256xf32> to vector<8x256xbf16>
    %c0_18 = arith.constant 0 : index
    %c0_19 = arith.constant 0 : index
    %26 = vector.load %arg8[%c0_18, %c0_19] : memref<256x128xbf16, #tpu.memory_space<vmem>>, vector<256x128xbf16>
    %cst_20 = arith.constant dense<0.000000e+00> : vector<8x128xf32>
    %27 = tpu.matmul %25, %26, %cst_20 {dimension_numbers = #tpu.dot_dimension_numbers<[1], [0], [0], [1], [0, 0, 1, 1], [], []>} : vector<8x256xbf16>, vector<256x128xbf16>, vector<8x128xf32> -> vector<8x128xf32>
    %c0_21 = arith.constant 0 : index
    %c0_22 = arith.constant 0 : index
    %28 = vector.load %arg9[%c0_21, %c0_22] : memref<1x128xf32, #tpu.memory_space<vmem>>, vector<1x128xf32>
    %29 = vector.broadcast %28 : vector<1x128xf32> to vector<8x128xf32>
    %30 = arith.addf %27, %29 : vector<8x128xf32>
    %cst_23 = arith.constant 0.000000e+00 : f32
    %31 = vector.broadcast %cst_23 : f32 to vector<8x128xf32>
    %32 = arith.maximumf %30, %31 : vector<8x128xf32>
    %33 = arith.truncf %32 : vector<8x128xf32> to vector<8x128xbf16>
    %c0_24 = arith.constant 0 : index
    %c0_25 = arith.constant 0 : index
    %34 = vector.load %arg10[%c0_24, %c0_25] : memref<128x128xbf16, #tpu.memory_space<vmem>>, vector<128x128xbf16>
    %cst_26 = arith.constant dense<0.000000e+00> : vector<8x128xf32>
    %35 = tpu.matmul %33, %34, %cst_26 {dimension_numbers = #tpu.dot_dimension_numbers<[1], [0], [0], [1], [0, 0, 1, 1], [], []>} : vector<8x128xbf16>, vector<128x128xbf16>, vector<8x128xf32> -> vector<8x128xf32>
    %c0_27 = arith.constant 0 : index
    %c0_28 = arith.constant 0 : index
    %36 = vector.load %arg11[%c0_27, %c0_28] : memref<1x128xf32, #tpu.memory_space<vmem>>, vector<1x128xf32>
    %37 = vector.broadcast %36 : vector<1x128xf32> to vector<8x128xf32>
    %38 = arith.addf %35, %37 : vector<8x128xf32>
    %c0_29 = arith.constant 0 : index
    %c0_30 = arith.constant 0 : index
    %39 = vector.load %arg12[%c0_29, %c0_30] : memref<8x128xf32, #tpu.memory_space<vmem>>, vector<8x128xf32>
    tpu.vector_store %arg12[%c0_29, %c0_30], %38 {strides = array<i32>} : memref<8x128xf32, #tpu.memory_space<vmem>>, vector<8x128xf32>,
    return
  }
  func.func @transform_0(%arg0: i32) -> (i32, i32) {
    %c0_i32 = arith.constant 0 : i32
    %c0_i32_0 = arith.constant 0 : i32
    return %arg0, %c0_i32 : i32, i32
  }
  func.func @transform_1(%arg0: i32) -> (i32, i32) {
    %c0_i32 = arith.constant 0 : i32
    %c0_i32_0 = arith.constant 0 : i32
    %c0_i32_1 = arith.constant 0 : i32
    return %c0_i32, %c0_i32_0 : i32, i32
  }
  func.func @transform_2(%arg0: i32) -> (i32, i32) {
    %c0_i32 = arith.constant 0 : i32
    %c0_i32_0 = arith.constant 0 : i32
    %c0_i32_1 = arith.constant 0 : i32
    return %c0_i32, %c0_i32_0 : i32, i32
  }
  func.func @transform_3(%arg0: i32) -> (i32, i32) {
    %c0_i32 = arith.constant 0 : i32
    %c0_i32_0 = arith.constant 0 : i32
    %c0_i32_1 = arith.constant 0 : i32
    return %c0_i32, %c0_i32_0 : i32, i32
  }
  func.func @transform_4(%arg0: i32) -> (i32, i32) {
    %c0_i32 = arith.constant 0 : i32
    %c0_i32_0 = arith.constant 0 : i32
    %c0_i32_1 = arith.constant 0 : i32
    return %c0_i32, %c0_i32_0 : i32, i32
  }
  func.func @transform_5(%arg0: i32) -> (i32, i32) {
    %c0_i32 = arith.constant 0 : i32
    %c0_i32_0 = arith.constant 0 : i32
    %c0_i32_1 = arith.constant 0 : i32
    return %c0_i32, %c0_i32_0 : i32, i32
  }
  func.func @transform_6(%arg0: i32) -> (i32, i32) {
    %c0_i32 = arith.constant 0 : i32
    %c0_i32_0 = arith.constant 0 : i32
    %c0_i32_1 = arith.constant 0 : i32
    return %c0_i32, %c0_i32_0 : i32, i32
  }
  func.func @transform_7(%arg0: i32) -> (i32, i32) {
    %c0_i32 = arith.constant 0 : i32
    %c0_i32_0 = arith.constant 0 : i32
    %c0_i32_1 = arith.constant 0 : i32
    return %c0_i32, %c0_i32_0 : i32, i32
  }
  func.func @transform_8(%arg0: i32) -> (i32, i32) {
    %c0_i32 = arith.constant 0 : i32
    %c0_i32_0 = arith.constant 0 : i32
    %c0_i32_1 = arith.constant 0 : i32
    return %c0_i32, %c0_i32_0 : i32, i32
  }
  func.func @transform_9(%arg0: i32) -> (i32, i32) {
    %c0_i32 = arith.constant 0 : i32
    %c0_i32_0 = arith.constant 0 : i32
    %c0_i32_1 = arith.constant 0 : i32
    return %c0_i32, %c0_i32_0 : i32, i32
  }
  func.func @transform_10(%arg0: i32) -> (i32, i32) {
    %c0_i32 = arith.constant 0 : i32
    %c0_i32_0 = arith.constant 0 : i32
    %c0_i32_1 = arith.constant 0 : i32
    return %c0_i32, %c0_i32_0 : i32, i32
  }
  func.func @transform_11(%arg0: i32) -> (i32, i32) {
    %c0_i32 = arith.constant 0 : i32
    %c0_i32_0 = arith.constant 0 : i32
    return %arg0, %c0_i32 : i32, i32
  }
}

</mosaic_0001>

<bundles_post_ra>
// kernel: tpu_custom_call.1
= control target key start
LH: loop header
LB: loop body
LE: loop exit
PB: predicated region body
PF: predicated region fallthrough
CT: control target
= control target key end

     0   :  { %16 = vsyncpa [#allocation3], 0  ;;  %s2852_s0 = inlined_call_operand.vmem [shape: f32[8,4], index: 0, kind: input, shape index: {}]   ;;  %s2853_s1 = inlined_call_operand.vmem [shape: bf16[4,512], index: 1, kind: input, shape index: {}]   ;;  %s2854_s2 = inlined_call_operand.vmem [shape: f32[1,512], index: 2, kind: input, shape index: {}]   ;;  %s2855_s3 = inlined_call_operand.hbm [shape: bf16[512,512], index: 3, kind: input, shape index: {}]   ;;  %s2856_s4 = inlined_call_operand.vmem [shape: f32[1,512], index: 4, kind: input, shape index: {}]   ;;  %s2857_s5 = inlined_call_operand.hbm [shape: bf16[512,256], index: 5, kind: input, shape index: {}]   ;;  %s2858_s6 = inlined_call_operand.vmem [shape: f32[1,256], index: 6, kind: input, shape index: {}]   ;;  %s2859_s7 = inlined_call_operand.hbm [shape: bf16[256,128], index: 7, kind: input, shape index: {}]   ;;  %s2860_s8 = inlined_call_operand.vmem [shape: f32[1,128], index: 8, kind: input, shape index: {}]   ;;  %s2861_s9 = inlined_call_operand.hbm [shape: bf16[128,128], index: 9, kind: input, shape index: {}]   ;;  %s2862_s10 = inlined_call_operand.vmem [shape: f32[1,128], index: 10, kind: input, shape index: {}]   ;;  %s2863_s11 = inlined_call_operand.hbm [shape: f32[8,128], index: 11, kind: output, shape index: {}]  }
   0x1   :  { %17 = vsyncpa [#allocation6], 0 }
   0x2   :  { %18 = vsyncpa [#allocation9], 0 }
   0x3   :  { %19 = vsyncpa [#allocation4], 0  ;;  %s2704_s17 = smov [#allocation5]  }
   0x4   :  { %s45_s18 = sshll.u32 %s2704_s17, 4  ;;  %s46_s18 = int_to_ptr.vmem [resolvable:$true] %s45_s18 }
   0x5   :  { %s2604_s19 = scalar_lea.vmem %s46_s18, 8192  ;;  %p2609_p1 = scmp.lt.s32.totalorder %s46_s18, %s46_s18 }
   0x6   :  { %p2605_p0 = scmp.ne.s32.totalorder %s46_s18, %s2604_s19  ;;  %p2610_p2 = scmp.lt.s32.totalorder %s2604_s19, %s2604_s19 }
   0x8   :  { %p2611_p3 = por %p2610_p2, %p2609_p1 }
   0xa   :  { %p2612_p4 = pnand %p2611_p3, %p2605_p0 }
   0xc   :  { %2615 = shalt.err (!%p2612_p4)
}
   0xd   :  { %s2705_s20 = smov 128   ;;  %s2706_s21 = smov 8  }
   0xe   :  { %51 = dma.hbm_to_vmem [thread:$0]  %s2857_s5, 8192, %s46_s18, [#allocation6], %s2705_s20, %s2705_s20, %s2706_s21  }
   0xf   :  { %s2707_s24 = smov [#allocation2]  }
  0x10   :  { %s31_s25 = sshll.u32 %s2707_s24, 4  ;;  %s32_s25 = int_to_ptr.vmem [resolvable:$true] %s31_s25 }
  0x11   :  { %s2624_s26 = scalar_lea.vmem %s32_s25, 16384  ;;  %p2629_p6 = scmp.lt.s32.totalorder %s32_s25, %s32_s25 }
  0x12   :  { %p2625_p5 = scmp.ne.s32.totalorder %s32_s25, %s2624_s26  ;;  %p2630_p7 = scmp.lt.s32.totalorder %s2624_s26, %s2624_s26 }
  0x14   :  { %p2631_p8 = por %p2630_p7, %p2629_p6 }
  0x16   :  { %p2632_p9 = pnand %p2631_p8, %p2625_p5 }
  0x18   :  { %2635 = shalt.err (!%p2632_p9)
}
  0x19   :  { %s2708_s27 = smov 256   ;;  %s2709_s28 = smov 16  }
  0x1a   :  { %37 = dma.hbm_to_vmem [thread:$0]  %s2855_s3, 16384, %s32_s25, [#allocation3], %s2708_s27, %s2708_s27, %s2709_s28  }
  0x1b   :  { %s2710_s12 = smov [#allocation7]  }
  0x1c   :  { %s59_s13 = sshll.u32 %s2710_s12, 4  ;;  %s60_s13 = int_to_ptr.vmem [resolvable:$true] %s59_s13 }
  0x1d   :  { %s2644_s5 = scalar_lea.vmem %s60_s13, 2048  ;;  %p2649_p11 = scmp.lt.s32.totalorder %s60_s13, %s60_s13 }
  0x1e   :  { %p2645_p10 = scmp.ne.s32.totalorder %s60_s13, %s2644_s5  ;;  %p2650_p12 = scmp.lt.s32.totalorder %s2644_s5, %s2644_s5 }
  0x20   :  { %p2651_p13 = por %p2650_p12, %p2649_p11 }
  0x22   :  { %p2652_p0 = pnand %p2651_p13, %p2645_p10 }
  0x24   :  { %2655 = shalt.err (!%p2652_p0)
}
  0x25   :  { %s2711_s14 = smov 64   ;;  %s2712_s15 = smov 4  }
  0x26   :  { %65 = dma.hbm_to_vmem [thread:$0]  %s2859_s7, 2048, %s60_s13, [#allocation6], %s2711_s14, %s2711_s14, %s2712_s15  }
  0x27   :  { %s2713_s18 = smov [#allocation8]  }
  0x28   :  { %s73_s19 = sshll.u32 %s2713_s18, 4  ;;  %s74_s19 = int_to_ptr.vmem [resolvable:$true] %s73_s19 }
  0x29   :  { %s2664_s3 = scalar_lea.vmem %s74_s19, 1024  ;;  %p2669_p2 = scmp.lt.s32.totalorder %s74_s19, %s74_s19 }
  0x2a   :  { %p2665_p1 = scmp.ne.s32.totalorder %s74_s19, %s2664_s3  ;;  %p2670_p3 = scmp.lt.s32.totalorder %s2664_s3, %s2664_s3 }
  0x2c   :  { %p2671_p4 = por %p2670_p3, %p2669_p2 }
  0x2e   :  { %p2672_p5 = pnand %p2671_p4, %p2665_p1 }
  0x30   :  { %2675 = shalt.err (!%p2672_p5)
}
  0x31   :  { %79 = dma.hbm_to_vmem [thread:$0]  %s2861_s9, 1024, %s74_s19, [#allocation9], %s2711_s14, %s2711_s14, %s2712_s15  }
  0x32   :  { %2696 = dma.done.wait [#allocation3], 16384  }
  0x33   :  { %2697 = vsyncadd [#allocation3], 4294950912 }
  0x34   :  { %2698 = dma.done.wait [#allocation6], 10240  }
  0x35   :  { %2699 = vsyncadd [#allocation6], 4294957056 }
  0x36   :  { %2700 = dma.done.wait [#allocation9], 1024  }
  0x37   :  { %2701 = vsyncadd [#allocation9], 4294966272  ;;  %v100_v0 = vlaneseq  ;;  %v2714_v1 = vmov 1983009808   ;;  %v2715_v3 = vmov 0   ;;  %v97_v7 = vld [vmem:[%s2853_s1] sm:$0xff] }
  0x38   :  { %v123_v2 = vunpack.c.l.s4 %v2714_v1  ;;  %187 = vmatprep.mubr.bf16.mxu0 %v2715_v3  ;;  %228 = vmatprep.mubr.bf16.mxu1 %v2715_v3  ;;  %vm142_vm0 = vcmask 1041408   ;;  %v121_v9 = vcombine.high %v97_v7, %v97_v7  ;;  %v95_v10 = vld [vmem:[%s2852_s0] sm:$0xff]  ;;  %vm138_vm1 = vcmask 31744   ;;  %s2718_s29 = smov [#allocation10]  }
  0x39   :  { %v2791_v4 = vshrl.u32 %v100_v0, 7  ;;  %v2286_v14 = vld [vmem:[#allocation2 + $0xe4] ss:$16 sps:$4 sm:$0xff]   ;;  %v96_v17 = vpack.c.bf16 %v95_v10, %v95_v10  ;;  %v2284_v19 = vld [vmem:[#allocation2 + $0xe0] ss:$16 sps:$4 sm:$0xff]   ;;  %vm2717_vm2 = vmmov 0  }
  0x3a   :  { %v124_v5 = vunpack.c.0.s8 %v123_v2  ;;  %v2289_v18 = vld [vmem:[#allocation2 + $0x2e4] ss:$16 sps:$4 sm:$0xff]   ;;  %v2287_v21 = vld [vmem:[#allocation2 + $0x2e0] ss:$16 sps:$4 sm:$0xff]   ;;  %s1984_s30 = sshll.u32 %s2718_s29, 4  ;;  %s1985_s30 = int_to_ptr.vmem [resolvable:$true] %s1984_s30 }
  0x3b   :  { %v2292_v20 = vld [vmem:[#allocation2 + $0xc4] ss:$16 sps:$4 sm:$0xff]   ;;  %v2290_v23 = vld [vmem:[#allocation2 + $0xc0] ss:$16 sps:$4 sm:$0xff]   ;;  %p2681_p7 = scmp.lt.s32.totalorder %s1985_s30, %s1985_s30 }
  0x3c   :  { %v127_v6 = vsub.s32 %v124_v5, %v2791_v4  ;;  %v2295_v22 = vld [vmem:[#allocation2 + $0x2c4] ss:$16 sps:$4 sm:$0xff]   ;;  %v2293_v25 = vld [vmem:[#allocation2 + $0x2c0] ss:$16 sps:$4 sm:$0xff]  }
  0x3d   :  { %v2298_v24 = vld [vmem:[#allocation2 + $0xa4] ss:$16 sps:$4 sm:$0xff]   ;;  %v2296_v27 = vld [vmem:[#allocation2 + $0xa0] ss:$16 sps:$4 sm:$0xff]  }
  0x3e   :  { %v128_v8 = vrot.slane %v97_v7, %v127_v6  ;;  %v135_v13 = vrot.slane %v121_v9, %v127_v6  ;;  %v2301_v26 = vld [vmem:[#allocation2 + $0x2a4] ss:$16 sps:$4 sm:$0xff]   ;;  %v2299_v29 = vld [vmem:[#allocation2 + $0x2a0] ss:$16 sps:$4 sm:$0xff]  }
  0x3f   :  { %v2304_v28 = vld [vmem:[#allocation2 + $0x84] ss:$16 sps:$4 sm:$0xff]   ;;  %v2302_v31 = vld [vmem:[#allocation2 + $0x80] ss:$16 sps:$4 sm:$0xff]  }
  0x40   :  { %v136_v11 = vcombine.high %v128_v8, %v128_v8  ;;  %v144_v12 = vsel %vm142_vm0, %v128_v8, 0  ;;  %v137_v15 = vcombine.high %v135_v13, %v135_v13  ;;  %v150_v16 = vsel %vm142_vm0, %v135_v13, 0  ;;  %v2307_v30 = vld [vmem:[#allocation2 + $0x284] ss:$16 sps:$4 sm:$0xff]   ;;  %v2305_v33 = vld [vmem:[#allocation2 + $0x280] ss:$16 sps:$4 sm:$0xff]  }
  0x41   :  { %v2310_v32 = vld [vmem:[#allocation2 + $0x64] ss:$16 sps:$4 sm:$0xff]   ;;  %v2308_v35 = vld [vmem:[#allocation2 + $0x60] ss:$16 sps:$4 sm:$0xff]  }
  0x42   :  { %1995 = vmatprep.subr.msk.bf16.mxu0 %vm142_vm0, %v136_v11  ;;  %1997 = vmatprep.subr.msk.bf16.mxu1 %vm142_vm0, %v137_v15  ;;  %v2313_v34 = vld [vmem:[#allocation2 + $0x264] ss:$16 sps:$4 sm:$0xff]   ;;  %v2311_v37 = vld [vmem:[#allocation2 + $0x260] ss:$16 sps:$4 sm:$0xff]  }
  0x43   :  { %170 = vmatpush1.bf16.msra.mxu0 %v144_v12  ;;  %211 = vmatpush1.bf16.msra.mxu1 %v150_v16  ;;  %v2316_v36 = vld [vmem:[#allocation2 + $0x44] ss:$16 sps:$4 sm:$0xff]   ;;  %v2314_v39 = vld [vmem:[#allocation2 + $0x40] ss:$16 sps:$4 sm:$0xff]  }
  0x44   :  { %1035 = vmatprep.subr.bf16.mxu0 %v2286_v14  ;;  %1076 = vmatprep.subr.bf16.mxu1 %v2289_v18  ;;  %v2319_v38 = vld [vmem:[#allocation2 + $0x244] ss:$16 sps:$4 sm:$0xff]   ;;  %v2317_v41 = vld [vmem:[#allocation2 + $0x240] ss:$16 sps:$4 sm:$0xff]   ;;  %v2382_v18 = vld [vmem:[#allocation2 + $0xec] ss:$16 sps:$4 sm:$0xff]  }
  0x45   :  { %v2322_v40 = vld [vmem:[#allocation2 + $0x24] ss:$16 sps:$4 sm:$0xff]   ;;  %v2320_v43 = vld [vmem:[#allocation2 + $0x20] ss:$16 sps:$4 sm:$0xff]  }
  0x46   :  { %1996 = vmatmul.mubr.msk.bf16.vlgmr.msra.gmra.mxu0 %vm138_vm1, %v96_v17  ;;  %1998 = vmatmul.mubr.msk.bf16.vlgmr.msra.gmra.mxu1 %vm138_vm1, %v96_v17  ;;  %v2325_v42 = vld [vmem:[#allocation2 + $0x224] ss:$16 sps:$4 sm:$0xff]   ;;  %v2323_v45 = vld [vmem:[#allocation2 + $0x220] ss:$16 sps:$4 sm:$0xff]  }
  0x47   :  { %1036 = vmatpush1.bf16.msra.mxu0 %v2284_v19  ;;  %1077 = vmatpush1.bf16.msra.mxu1 %v2287_v21  ;;  %v2328_v44 = vld [vmem:[#allocation2 + $0x4] ss:$16 sps:$4 sm:$0xff]   ;;  %v2326_v47 = vld [vmem:[#allocation2] ss:$16 sps:$4 sm:$0xff]   ;;  %v2385_v19 = vld [vmem:[#allocation2 + $0x2ec] ss:$16 sps:$4 sm:$0xff]  }
  0x48   :  { %1037 = vmatprep.subr.bf16.mxu0 %v2292_v20  ;;  %1078 = vmatprep.subr.bf16.mxu1 %v2295_v22  ;;  %v2331_v46 = vld [vmem:[#allocation2 + $0x204] ss:$16 sps:$4 sm:$0xff]   ;;  %v2329_v49 = vld [vmem:[#allocation2 + $0x200] ss:$16 sps:$4 sm:$0xff]   ;;  %v2805_v20 = vsub.s32 0, %v2791_v4  ;;  %v2811_v22 = vsub.s32 1, %v2791_v4 }
  0x49   :  { %v2334_v48 = vld [vmem:[#allocation2 + $0x1e4] ss:$16 sps:$4 sm:$0xff]   ;;  %v2332_v50 = vld [vmem:[#allocation2 + $0x1e0] ss:$16 sps:$4 sm:$0xff]  }
  0x4a   :  { %v2337_v51 = vld [vmem:[#allocation2 + $0x3e4] ss:$16 sps:$4 sm:$0xff]   ;;  %v2335_v52 = vld [vmem:[#allocation2 + $0x3e0] ss:$16 sps:$4 sm:$0xff]  }
  0x4b   :  { %1038 = vmatpush1.bf16.msra.mxu0 %v2290_v23  ;;  %1079 = vmatpush1.bf16.msra.mxu1 %v2293_v25  ;;  %v2340_v53 = vld [vmem:[#allocation2 + $0x1c4] ss:$16 sps:$4 sm:$0xff]   ;;  %v2338_v55 = vld [vmem:[#allocation2 + $0x1c0] ss:$16 sps:$4 sm:$0xff]   ;;  %v110_v23 = vsub.s32 2, %v2791_v4  ;;  %v114_v25 = vsub.s32 3, %v2791_v4 }
  0x4c   :  { %1039 = vmatprep.subr.bf16.mxu0 %v2298_v24  ;;  %1080 = vmatprep.subr.bf16.mxu1 %v2301_v26  ;;  %v2343_v54 = vld [vmem:[#allocation2 + $0x3c4] ss:$16 sps:$4 sm:$0xff]   ;;  %v2341_v57 = vld [vmem:[#allocation2 + $0x3c0] ss:$16 sps:$4 sm:$0xff]   ;;  %v2572_v4 = vld [vmem:[#allocation7 + $0x78] sm:$0xff]  }
  0x4d   :  { %v2346_v56 = vld [vmem:[#allocation2 + $0x1a4] ss:$16 sps:$4 sm:$0xff]   ;;  %v2344_v59 = vld [vmem:[#allocation2 + $0x1a0] ss:$16 sps:$4 sm:$0xff]  }
  0x4e   :  { %v2349_v58 = vld [vmem:[#allocation2 + $0x3a4] ss:$16 sps:$4 sm:$0xff]   ;;  %v2347_v61 = vld [vmem:[#allocation2 + $0x3a0] ss:$16 sps:$4 sm:$0xff]  }
  0x4f   :  { %1040 = vmatpush1.bf16.msra.mxu0 %v2296_v27  ;;  %1081 = vmatpush1.bf16.msra.mxu1 %v2299_v29  ;;  %v2352_v60 = vld [vmem:[#allocation2 + $0x184] ss:$16 sps:$4 sm:$0xff]   ;;  %v2350_v63 = vld [vmem:[#allocation2 + $0x180] ss:$16 sps:$4 sm:$0xff]  }
  0x50   :  { %1041 = vmatprep.subr.bf16.mxu0 %v2304_v28  ;;  %1082 = vmatprep.subr.bf16.mxu1 %v2307_v30  ;;  %v2355_v62 = vld [vmem:[#allocation2 + $0x384] ss:$16 sps:$4 sm:$0xff]   ;;  %v2353_v1 = vld [vmem:[#allocation2 + $0x380] ss:$16 sps:$4 sm:$0xff]  }
  0x51   :  { %v2358_v0 = vld [vmem:[#allocation2 + $0x164] ss:$16 sps:$4 sm:$0xff]   ;;  %v2356_v3 = vld [vmem:[#allocation2 + $0x160] ss:$16 sps:$4 sm:$0xff]  }
  0x52   :  { %v2361_v2 = vld [vmem:[#allocation2 + $0x364] ss:$16 sps:$4 sm:$0xff]   ;;  %v2359_v6 = vld [vmem:[#allocation2 + $0x360] ss:$16 sps:$4 sm:$0xff]  }
  0x53   :  { %1042 = vmatpush1.bf16.msra.mxu0 %v2302_v31  ;;  %1083 = vmatpush1.bf16.msra.mxu1 %v2305_v33  ;;  %v2364_v5 = vld [vmem:[#allocation2 + $0x144] ss:$16 sps:$4 sm:$0xff]   ;;  %v2362_v8 = vld [vmem:[#allocation2 + $0x140] ss:$16 sps:$4 sm:$0xff]  }
  0x54   :  { %1043 = vmatprep.subr.bf16.mxu0 %v2310_v32  ;;  %1084 = vmatprep.subr.bf16.mxu1 %v2313_v34  ;;  %v2367_v7 = vld [vmem:[#allocation2 + $0x344] ss:$16 sps:$4 sm:$0xff]   ;;  %v2365_v9 = vld [vmem:[#allocation2 + $0x340] ss:$16 sps:$4 sm:$0xff]  }
  0x55   :  { %v2370_v10 = vld [vmem:[#allocation2 + $0x124] ss:$16 sps:$4 sm:$0xff]   ;;  %v2368_v11 = vld [vmem:[#allocation2 + $0x120] ss:$16 sps:$4 sm:$0xff]  }
  0x56   :  { %v2373_v12 = vld [vmem:[#allocation2 + $0x324] ss:$16 sps:$4 sm:$0xff]   ;;  %v2371_v13 = vld [vmem:[#allocation2 + $0x320] ss:$16 sps:$4 sm:$0xff]  }
  0x57   :  { %1044 = vmatpush1.bf16.msra.mxu0 %v2308_v35  ;;  %1085 = vmatpush1.bf16.msra.mxu1 %v2311_v37  ;;  %v2376_v14 = vld [vmem:[#allocation2 + $0x104] ss:$16 sps:$4 sm:$0xff]   ;;  %v2374_v15 = vld [vmem:[#allocation2 + $0x100] ss:$16 sps:$4 sm:$0xff]  }
  0x58   :  { %1045 = vmatprep.subr.bf16.mxu0 %v2316_v36  ;;  %1086 = vmatprep.subr.bf16.mxu1 %v2319_v38  ;;  %v2379_v16 = vld [vmem:[#allocation2 + $0x304] ss:$16 sps:$4 sm:$0xff]   ;;  %v2377_v17 = vld [vmem:[#allocation2 + $0x300] ss:$16 sps:$4 sm:$0xff]  }
  0x59   :  { %v98_v21 = vld [vmem:[%s2854_s2] sm:$0xf] }
  0x5a   :  { %v103_v24 = vrot.slane %v98_v21, %v2805_v20  ;;  %v107_v26 = vrot.slane %v98_v21, %v2811_v22  ;;  %v111_v27 = vrot.slane %v98_v21, %v110_v23  ;;  %v115_v30 = vrot.slane %v98_v21, %v114_v25  ;;  %v2431_v21 = vld [vmem:[#allocation2 + $0x3e8] ss:$16 sps:$4 sm:$0xff]  }
  0x5b   :  { %1046 = vmatpush1.bf16.msra.mxu0 %v2314_v39  ;;  %1087 = vmatpush1.bf16.msra.mxu1 %v2317_v41 }
  0x5c   :  { %1047 = vmatprep.subr.bf16.mxu0 %v2322_v40  ;;  %1088 = vmatprep.subr.bf16.mxu1 %v2325_v42 }
  0x5f   :  { %1048 = vmatpush1.bf16.msra.mxu0 %v2320_v43  ;;  %1089 = vmatpush1.bf16.msra.mxu1 %v2323_v45  ;;  %v2380_v45 = vld [vmem:[#allocation2 + $0xe8] ss:$16 sps:$4 sm:$0xff]  }
  0x60   :  { %1049 = vmatprep.subr.bf16.mxu0 %v2328_v44  ;;  %1090 = vmatprep.subr.bf16.mxu1 %v2331_v46 }
  0x63   :  { %1050 = vmatpush1.bf16.msra.mxu0 %v2326_v47  ;;  %1091 = vmatpush1.bf16.msra.mxu1 %v2329_v49  ;;  %v2383_v49 = vld [vmem:[#allocation2 + $0x2e8] ss:$16 sps:$4 sm:$0xff]  }
  0x64   :  { %1051 = vmatprep.subr.bf16.mxu0 %v2334_v48  ;;  %1092 = vmatprep.subr.bf16.mxu1 %v2337_v51 }
  0x67   :  { %1052 = vmatpush2.bf16.msra.mxu0 %v2332_v50  ;;  %1093 = vmatpush2.bf16.msra.mxu1 %v2335_v52  ;;  %v2388_v50 = vld [vmem:[#allocation2 + $0xcc] ss:$16 sps:$4 sm:$0xff]  }
  0x68   :  { %1053 = vmatprep.subr.bf16.mxu0 %v2340_v53  ;;  %1094 = vmatprep.subr.bf16.mxu1 %v2343_v54  ;;  %v2391_v52 = vld [vmem:[#allocation2 + $0x2cc] ss:$16 sps:$4 sm:$0xff]   ;;  %v2386_v53 = vld [vmem:[#allocation2 + $0xc8] ss:$16 sps:$4 sm:$0xff]  }
  0x69   :  { %v2394_v54 = vld [vmem:[#allocation2 + $0xac] ss:$16 sps:$4 sm:$0xff]  }
  0x6b   :  { %1054 = vmatpush2.bf16.msra.mxu0 %v2338_v55  ;;  %1095 = vmatpush2.bf16.msra.mxu1 %v2341_v57  ;;  %v2389_v55 = vld [vmem:[#allocation2 + $0x2c8] ss:$16 sps:$4 sm:$0xff]  }
  0x6c   :  { %1055 = vmatprep.subr.bf16.mxu0 %v2346_v56  ;;  %1096 = vmatprep.subr.bf16.mxu1 %v2349_v58  ;;  %v2397_v56 = vld [vmem:[#allocation2 + $0x2ac] ss:$16 sps:$4 sm:$0xff]   ;;  %v2392_v57 = vld [vmem:[#allocation2 + $0xa8] ss:$16 sps:$4 sm:$0xff]  }
  0x6d   :  { %v2400_v58 = vld [vmem:[#allocation2 + $0x8c] ss:$16 sps:$4 sm:$0xff]  }
  0x6f   :  { %1056 = vmatpush2.bf16.msra.mxu0 %v2344_v59  ;;  %1097 = vmatpush2.bf16.msra.mxu1 %v2347_v61  ;;  %v2395_v59 = vld [vmem:[#allocation2 + $0x2a8] ss:$16 sps:$4 sm:$0xff]  }
  0x70   :  { %1057 = vmatprep.subr.bf16.mxu0 %v2352_v60  ;;  %1098 = vmatprep.subr.bf16.mxu1 %v2355_v62  ;;  %v2403_v60 = vld [vmem:[#allocation2 + $0x28c] ss:$16 sps:$4 sm:$0xff]   ;;  %v2398_v61 = vld [vmem:[#allocation2 + $0x88] ss:$16 sps:$4 sm:$0xff]  }
  0x71   :  { %v2406_v62 = vld [vmem:[#allocation2 + $0x6c] ss:$16 sps:$4 sm:$0xff]  }
  0x73   :  { %1058 = vmatpush2.bf16.msra.mxu0 %v2350_v63  ;;  %1099 = vmatpush2.bf16.msra.mxu1 %v2353_v1  ;;  %v2401_v63 = vld [vmem:[#allocation2 + $0x288] ss:$16 sps:$4 sm:$0xff]  }
  0x74   :  { %1059 = vmatprep.subr.bf16.mxu0 %v2358_v0  ;;  %1100 = vmatprep.subr.bf16.mxu1 %v2361_v2  ;;  %v2409_v0 = vld [vmem:[#allocation2 + $0x26c] ss:$16 sps:$4 sm:$0xff]   ;;  %v2404_v1 = vld [vmem:[#allocation2 + $0x68] ss:$16 sps:$4 sm:$0xff]  }
  0x75   :  { %v2412_v2 = vld [vmem:[#allocation2 + $0x4c] ss:$16 sps:$4 sm:$0xff]  }
  0x77   :  { %1060 = vmatpush2.bf16.msra.mxu0 %v2356_v3  ;;  %1101 = vmatpush2.bf16.msra.mxu1 %v2359_v6  ;;  %v2407_v3 = vld [vmem:[#allocation2 + $0x268] ss:$16 sps:$4 sm:$0xff]  }
  0x78   :  { %1061 = vmatprep.subr.bf16.mxu0 %v2364_v5  ;;  %1102 = vmatprep.subr.bf16.mxu1 %v2367_v7  ;;  %v2415_v5 = vld [vmem:[#allocation2 + $0x24c] ss:$16 sps:$4 sm:$0xff]   ;;  %v2410_v6 = vld [vmem:[#allocation2 + $0x48] ss:$16 sps:$4 sm:$0xff]  }
  0x79   :  { %v2418_v7 = vld [vmem:[#allocation2 + $0x2c] ss:$16 sps:$4 sm:$0xff]  }
  0x7b   :  { %1062 = vmatpush2.bf16.msra.mxu0 %v2362_v8  ;;  %1103 = vmatpush2.bf16.msra.mxu1 %v2365_v9  ;;  %v2413_v8 = vld [vmem:[#allocation2 + $0x248] ss:$16 sps:$4 sm:$0xff]   ;;  %v2421_v9 = vld [vmem:[#allocation2 + $0x22c] ss:$16 sps:$4 sm:$0xff]  }
  0x7c   :  { %1063 = vmatprep.subr.bf16.mxu0 %v2370_v10  ;;  %1104 = vmatprep.subr.bf16.mxu1 %v2373_v12  ;;  %v2416_v10 = vld [vmem:[#allocation2 + $0x28] ss:$16 sps:$4 sm:$0xff]  }
  0x7d   :  { %v2419_v12 = vld [vmem:[#allocation2 + $0x228] ss:$16 sps:$4 sm:$0xff]  }
  0x7f   :  { %1064 = vmatpush2.bf16.msra.mxu0 %v2368_v11  ;;  %1105 = vmatpush2.bf16.msra.mxu1 %v2371_v13  ;;  %v2424_v11 = vld [vmem:[#allocation2 + $0xc] ss:$16 sps:$4 sm:$0xff]  }
  0x80   :  { %1065 = vmatprep.subr.bf16.mxu0 %v2376_v14  ;;  %1106 = vmatprep.subr.bf16.mxu1 %v2379_v16  ;;  %v2427_v13 = vld [vmem:[#allocation2 + $0x20c] ss:$16 sps:$4 sm:$0xff]   ;;  %v2422_v14 = vld [vmem:[#allocation2 + $0x8] ss:$16 sps:$4 sm:$0xff]  }
  0x81   :  { %v2425_v16 = vld [vmem:[#allocation2 + $0x208] ss:$16 sps:$4 sm:$0xff]  }
  0x83   :  { %1066 = vmatpush2.bf16.msra.mxu0 %v2374_v15  ;;  %1107 = vmatpush2.bf16.msra.mxu1 %v2377_v17  ;;  %v2430_v15 = vld [vmem:[#allocation2 + $0x1ec] ss:$16 sps:$4 sm:$0xff]  }
  0x84   :  { %1117 = vmatprep.subr.bf16.mxu0 %v2382_v18  ;;  %1158 = vmatprep.subr.bf16.mxu1 %v2385_v19  ;;  %v2433_v17 = vld [vmem:[#allocation2 + $0x3ec] ss:$16 sps:$4 sm:$0xff]   ;;  %v2428_v18 = vld [vmem:[#allocation2 + $0x1e8] ss:$16 sps:$4 sm:$0xff]  }
  0x85   :  { %v2436_v19 = vld [vmem:[#allocation2 + $0x1cc] ss:$16 sps:$4 sm:$0xff]  }
 0x106   :  { %v189_v28 = vpop.f32.mrf.mxu0  ;;  %v230_v32 = vpop.f32.mrf.mxu1 }
 0x107   :  { %v190_v29 = vadd.f32 %v189_v28, %v103_v24  ;;  %v231_v34 = vadd.f32 %v230_v32, %v111_v27  ;;  %v2439_v24 = vld [vmem:[#allocation2 + $0x3cc] ss:$16 sps:$4 sm:$0xff]   ;;  %v2437_v28 = vld [vmem:[#allocation2 + $0x3c8] ss:$16 sps:$4 sm:$0xff]  }
 0x108   :  { %v191_v31 = vpop.f32.mrf.mxu0  ;;  %v232_v37 = vpop.f32.mrf.mxu1  ;;  %v2442_v27 = vld [vmem:[#allocation2 + $0x1ac] ss:$16 sps:$4 sm:$0xff]   ;;  %v2443_v32 = vld [vmem:[#allocation2 + $0x3a8] ss:$16 sps:$4 sm:$0xff]  }
 0x109   :  { %v192_v33 = vadd.f32 %v191_v31, %v107_v26  ;;  %v237_v35 = vmax.f32 %v190_v29, 0.0  ;;  %v233_v39 = vadd.f32 %v232_v37, %v115_v30  ;;  %v239_v40 = vmax.f32 %v231_v34, 0.0  ;;  %v2434_v26 = vld [vmem:[#allocation2 + $0x1c8] ss:$16 sps:$4 sm:$0xff]   ;;  %v2445_v29 = vld [vmem:[#allocation2 + $0x3ac] ss:$16 sps:$4 sm:$0xff]  }
 0x10a   :  { %v193_v36 = vpop.f32.mrf.mxu0  ;;  %v234_v42 = vpop.f32.mrf.mxu1  ;;  %v2440_v30 = vld [vmem:[#allocation2 + $0x1a8] ss:$16 sps:$4 sm:$0xff]   ;;  %v2448_v31 = vld [vmem:[#allocation2 + $0x18c] ss:$16 sps:$4 sm:$0xff]  }
 0x10b   :  { %v238_v38 = vmax.f32 %v192_v33, 0.0  ;;  %v240_v44 = vmax.f32 %v233_v39, 0.0  ;;  %v2821_v46 = vpack.c.bf16 %v237_v35, %v237_v35  ;;  %v2823_v51 = vpack.c.bf16 %v239_v40, %v239_v40  ;;  %v2451_v33 = vld [vmem:[#allocation2 + $0x38c] ss:$16 sps:$4 sm:$0xff]   ;;  %v2446_v34 = vld [vmem:[#allocation2 + $0x188] ss:$16 sps:$4 sm:$0xff]  }
 0x10c   :  { %v194_v41 = vpop.f32.mrf.mxu0  ;;  %v235_v47 = vpop.f32.mrf.mxu1  ;;  %v2454_v35 = vld [vmem:[#allocation2 + $0x16c] ss:$16 sps:$4 sm:$0xff]   ;;  %v2449_v36 = vld [vmem:[#allocation2 + $0x388] ss:$16 sps:$4 sm:$0xff]  }
 0x10d   :  { %v242_v43 = vpack.c.bf16 %v238_v38, %v238_v38  ;;  %v244_v48 = vpack.c.bf16 %v240_v44, %v240_v44  ;;  %v2457_v37 = vld [vmem:[#allocation2 + $0x36c] ss:$16 sps:$4 sm:$0xff]   ;;  %v2452_v38 = vld [vmem:[#allocation2 + $0x168] ss:$16 sps:$4 sm:$0xff]  }
 0x10e   :  { %v2460_v39 = vld [vmem:[#allocation2 + $0x14c] ss:$16 sps:$4 sm:$0xff]   ;;  %v2455_v40 = vld [vmem:[#allocation2 + $0x368] ss:$16 sps:$4 sm:$0xff]  }
 0x10f   :  { %1067 = vmatprep.mubr.bf16.mxu0 %v242_v43  ;;  %1108 = vmatprep.mubr.bf16.mxu1 %v244_v48  ;;  %v2463_v41 = vld [vmem:[#allocation2 + $0x34c] ss:$16 sps:$4 sm:$0xff]   ;;  %v2458_v42 = vld [vmem:[#allocation2 + $0x148] ss:$16 sps:$4 sm:$0xff]  }
 0x110   :  { %1068 = vmatmul.mubr.bf16.vlgmr.msra.gmra.mxu0 %v2821_v46  ;;  %1109 = vmatmul.mubr.bf16.vlgmr.msra.gmra.mxu1 %v2823_v51  ;;  %v2461_v44 = vld [vmem:[#allocation2 + $0x348] ss:$16 sps:$4 sm:$0xff]  }
 0x111   :  { %1118 = vmatpush1.bf16.msra.mxu0 %v2380_v45  ;;  %1149 = vmatprep.mubr.bf16.mxu0 %v242_v43  ;;  %v2466_v43 = vld [vmem:[#allocation2 + $0x12c] ss:$16 sps:$4 sm:$0xff]   ;;  %v2464_v47 = vld [vmem:[#allocation2 + $0x128] ss:$16 sps:$4 sm:$0xff]  }
 0x112   :  { %1159 = vmatpush1.bf16.msra.mxu1 %v2383_v49  ;;  %1119 = vmatprep.subr.bf16.mxu0 %v2388_v50  ;;  %v2469_v45 = vld [vmem:[#allocation2 + $0x32c] ss:$16 sps:$4 sm:$0xff]   ;;  %v2467_v49 = vld [vmem:[#allocation2 + $0x328] ss:$16 sps:$4 sm:$0xff]  }
 0x113   :  { %1190 = vmatprep.mubr.bf16.mxu1 %v244_v48  ;;  %1160 = vmatprep.subr.bf16.mxu1 %v2391_v52  ;;  %v2472_v48 = vld [vmem:[#allocation2 + $0x10c] ss:$16 sps:$4 sm:$0xff]   ;;  %v2470_v52 = vld [vmem:[#allocation2 + $0x108] ss:$16 sps:$4 sm:$0xff]  }
 0x114   :  { %v2475_v50 = vld [vmem:[#allocation2 + $0x30c] ss:$16 sps:$4 sm:$0xff]  }
 0x115   :  { %1120 = vmatpush1.bf16.msra.mxu0 %v2386_v53  ;;  %v2478_v53 = vld [vmem:[#allocation5 + $0x74] ss:$8 sps:$4 sm:$0xff]  }
 0x116   :  { %1121 = vmatprep.subr.bf16.mxu0 %v2394_v54  ;;  %1161 = vmatpush1.bf16.msra.mxu1 %v2389_v55  ;;  %v2473_v54 = vld [vmem:[#allocation2 + $0x308] ss:$16 sps:$4 sm:$0xff]  }
 0x117   :  { %1162 = vmatprep.subr.bf16.mxu1 %v2397_v56  ;;  %v2476_v55 = vld [vmem:[#allocation5 + $0x70] ss:$8 sps:$4 sm:$0xff]   ;;  %v2481_v56 = vld [vmem:[#allocation5 + $0x64] ss:$8 sps:$4 sm:$0xff]  }
 0x119   :  { %1122 = vmatpush1.bf16.msra.mxu0 %v2392_v57  ;;  %v2479_v57 = vld [vmem:[#allocation5 + $0x60] ss:$8 sps:$4 sm:$0xff]  }
 0x11a   :  { %1123 = vmatprep.subr.bf16.mxu0 %v2400_v58  ;;  %1163 = vmatpush1.bf16.msra.mxu1 %v2395_v59  ;;  %v2484_v58 = vld [vmem:[#allocation5 + $0x54] ss:$8 sps:$4 sm:$0xff]   ;;  %v2482_v59 = vld [vmem:[#allocation5 + $0x50] ss:$8 sps:$4 sm:$0xff]  }
 0x11b   :  { %1164 = vmatprep.subr.bf16.mxu1 %v2403_v60  ;;  %v2487_v60 = vld [vmem:[#allocation5 + $0x44] ss:$8 sps:$4 sm:$0xff]  }
 0x11d   :  { %1124 = vmatpush1.bf16.msra.mxu0 %v2398_v61  ;;  %v2485_v61 = vld [vmem:[#allocation5 + $0x40] ss:$8 sps:$4 sm:$0xff]  }
 0x11e   :  { %1125 = vmatprep.subr.bf16.mxu0 %v2406_v62  ;;  %1165 = vmatpush1.bf16.msra.mxu1 %v2401_v63  ;;  %v2490_v62 = vld [vmem:[#allocation5 + $0x34] ss:$8 sps:$4 sm:$0xff]  }
 0x11f   :  { %1166 = vmatprep.subr.bf16.mxu1 %v2409_v0  ;;  %v2526_v63 = vld [vmem:[#allocation5 + $0x174] ss:$8 sps:$4 sm:$0xff]   ;;  %v2524_v0 = vld [vmem:[#allocation5 + $0x170] ss:$8 sps:$4 sm:$0xff]  }
 0x121   :  { %1126 = vmatpush1.bf16.msra.mxu0 %v2404_v1  ;;  %v2529_v1 = vld [vmem:[#allocation5 + $0x164] ss:$8 sps:$4 sm:$0xff]  }
 0x122   :  { %1127 = vmatprep.subr.bf16.mxu0 %v2412_v2  ;;  %1167 = vmatpush1.bf16.msra.mxu1 %v2407_v3  ;;  %v2527_v2 = vld [vmem:[#allocation5 + $0x160] ss:$8 sps:$4 sm:$0xff]   ;;  %v2532_v3 = vld [vmem:[#allocation5 + $0x154] ss:$8 sps:$4 sm:$0xff]  }
 0x123   :  { %1168 = vmatprep.subr.bf16.mxu1 %v2415_v5  ;;  %v2491_v5 = vld [vmem:[#allocation5 + $0x20] ss:$8 sps:$4 sm:$0xff]  }
 0x125   :  { %1128 = vmatpush1.bf16.msra.mxu0 %v2410_v6  ;;  %v2530_v6 = vld [vmem:[#allocation5 + $0x150] ss:$8 sps:$4 sm:$0xff]  }
 0x126   :  { %1129 = vmatprep.subr.bf16.mxu0 %v2418_v7  ;;  %1169 = vmatpush1.bf16.msra.mxu1 %v2413_v8  ;;  %v2496_v7 = vld [vmem:[#allocation5 + $0x14] ss:$8 sps:$4 sm:$0xff]   ;;  %v2535_v8 = vld [vmem:[#allocation5 + $0x144] ss:$8 sps:$4 sm:$0xff]  }
 0x127   :  { %1170 = vmatprep.subr.bf16.mxu1 %v2421_v9  ;;  %v2494_v9 = vld [vmem:[#allocation5 + $0x10] ss:$8 sps:$4 sm:$0xff]  }
 0x129   :  { %1130 = vmatpush1.bf16.msra.mxu0 %v2416_v10  ;;  %v2533_v10 = vld [vmem:[#allocation5 + $0x140] ss:$8 sps:$4 sm:$0xff]  }
 0x12a   :  { %1131 = vmatprep.subr.bf16.mxu0 %v2424_v11  ;;  %1171 = vmatpush1.bf16.msra.mxu1 %v2419_v12  ;;  %v2499_v11 = vld [vmem:[#allocation5 + $0x4] ss:$8 sps:$4 sm:$0xff]   ;;  %v2538_v12 = vld [vmem:[#allocation5 + $0x134] ss:$8 sps:$4 sm:$0xff]  }
 0x12b   :  { %1172 = vmatprep.subr.bf16.mxu1 %v2427_v13  ;;  %v2497_v13 = vld [vmem:[#allocation5] ss:$8 sps:$4 sm:$0xff]  }
 0x12d   :  { %1132 = vmatpush1.bf16.msra.mxu0 %v2422_v14  ;;  %v2536_v14 = vld [vmem:[#allocation5 + $0x130] ss:$8 sps:$4 sm:$0xff]  }
 0x12e   :  { %1133 = vmatprep.subr.bf16.mxu0 %v2430_v15  ;;  %1173 = vmatpush1.bf16.msra.mxu1 %v2425_v16  ;;  %v2502_v15 = vld [vmem:[#allocation5 + $0xf4] ss:$8 sps:$4 sm:$0xff]   ;;  %v2541_v16 = vld [vmem:[#allocation5 + $0x124] ss:$8 sps:$4 sm:$0xff]  }
 0x12f   :  { %1174 = vmatprep.subr.bf16.mxu1 %v2433_v17  ;;  %v2500_v17 = vld [vmem:[#allocation5 + $0xf0] ss:$8 sps:$4 sm:$0xff]  }
 0x131   :  { %1134 = vmatpush2.bf16.msra.mxu0 %v2428_v18  ;;  %v2539_v18 = vld [vmem:[#allocation5 + $0x120] ss:$8 sps:$4 sm:$0xff]  }
 0x132   :  { %1135 = vmatprep.subr.bf16.mxu0 %v2436_v19  ;;  %1175 = vmatpush2.bf16.msra.mxu1 %v2431_v21  ;;  %v2505_v19 = vld [vmem:[#allocation5 + $0xe4] ss:$8 sps:$4 sm:$0xff]   ;;  %v2544_v21 = vld [vmem:[#allocation5 + $0x114] ss:$8 sps:$4 sm:$0xff]  }
 0x133   :  { %1176 = vmatprep.subr.bf16.mxu1 %v2439_v24  ;;  %v2503_v24 = vld [vmem:[#allocation5 + $0xe0] ss:$8 sps:$4 sm:$0xff]  }
 0x135   :  { %1136 = vmatpush2.bf16.msra.mxu0 %v2434_v26  ;;  %v2542_v26 = vld [vmem:[#allocation5 + $0x110] ss:$8 sps:$4 sm:$0xff]  }
 0x136   :  { %1137 = vmatprep.subr.bf16.mxu0 %v2442_v27  ;;  %1177 = vmatpush2.bf16.msra.mxu1 %v2437_v28  ;;  %v2508_v27 = vld [vmem:[#allocation5 + $0xd4] ss:$8 sps:$4 sm:$0xff]   ;;  %v2547_v28 = vld [vmem:[#allocation5 + $0x104] ss:$8 sps:$4 sm:$0xff]  }
 0x137   :  { %1178 = vmatprep.subr.bf16.mxu1 %v2445_v29  ;;  %v2506_v29 = vld [vmem:[#allocation5 + $0xd0] ss:$8 sps:$4 sm:$0xff]  }
 0x139   :  { %1138 = vmatpush2.bf16.msra.mxu0 %v2440_v30  ;;  %v2545_v30 = vld [vmem:[#allocation5 + $0x100] ss:$8 sps:$4 sm:$0xff]  }
 0x13a   :  { %1139 = vmatprep.subr.bf16.mxu0 %v2448_v31  ;;  %1179 = vmatpush2.bf16.msra.mxu1 %v2443_v32  ;;  %v2511_v31 = vld [vmem:[#allocation5 + $0xc4] ss:$8 sps:$4 sm:$0xff]   ;;  %v2550_v32 = vld [vmem:[#allocation5 + $0x1f4] ss:$8 sps:$4 sm:$0xff]  }
 0x13b   :  { %1180 = vmatprep.subr.bf16.mxu1 %v2451_v33  ;;  %v2509_v33 = vld [vmem:[#allocation5 + $0xc0] ss:$8 sps:$4 sm:$0xff]  }
 0x13d   :  { %1140 = vmatpush2.bf16.msra.mxu0 %v2446_v34  ;;  %v2548_v34 = vld [vmem:[#allocation5 + $0x1f0] ss:$8 sps:$4 sm:$0xff]  }
 0x13e   :  { %1141 = vmatprep.subr.bf16.mxu0 %v2454_v35  ;;  %1181 = vmatpush2.bf16.msra.mxu1 %v2449_v36  ;;  %v2514_v35 = vld [vmem:[#allocation5 + $0xb4] ss:$8 sps:$4 sm:$0xff]   ;;  %v2553_v36 = vld [vmem:[#allocation5 + $0x1e4] ss:$8 sps:$4 sm:$0xff]  }
 0x13f   :  { %1182 = vmatprep.subr.bf16.mxu1 %v2457_v37  ;;  %v2512_v37 = vld [vmem:[#allocation5 + $0xb0] ss:$8 sps:$4 sm:$0xff]  }
 0x141   :  { %1142 = vmatpush2.bf16.msra.mxu0 %v2452_v38  ;;  %v2551_v38 = vld [vmem:[#allocation5 + $0x1e0] ss:$8 sps:$4 sm:$0xff]  }
 0x142   :  { %1143 = vmatprep.subr.bf16.mxu0 %v2460_v39  ;;  %1183 = vmatpush2.bf16.msra.mxu1 %v2455_v40  ;;  %v2517_v39 = vld [vmem:[#allocation5 + $0xa4] ss:$8 sps:$4 sm:$0xff]   ;;  %v2556_v40 = vld [vmem:[#allocation5 + $0x1d4] ss:$8 sps:$4 sm:$0xff]  }
 0x143   :  { %1184 = vmatprep.subr.bf16.mxu1 %v2463_v41  ;;  %v2515_v41 = vld [vmem:[#allocation5 + $0xa0] ss:$8 sps:$4 sm:$0xff]  }
 0x145   :  { %1144 = vmatpush2.bf16.msra.mxu0 %v2458_v42  ;;  %v2554_v42 = vld [vmem:[#allocation5 + $0x1d0] ss:$8 sps:$4 sm:$0xff]  }
 0x146   :  { %1145 = vmatprep.subr.bf16.mxu0 %v2466_v43  ;;  %1185 = vmatpush2.bf16.msra.mxu1 %v2461_v44  ;;  %v2520_v43 = vld [vmem:[#allocation5 + $0x94] ss:$8 sps:$4 sm:$0xff]   ;;  %v2559_v44 = vld [vmem:[#allocation5 + $0x1c4] ss:$8 sps:$4 sm:$0xff]  }
 0x147   :  { %1186 = vmatprep.subr.bf16.mxu1 %v2469_v45  ;;  %v2518_v45 = vld [vmem:[#allocation5 + $0x90] ss:$8 sps:$4 sm:$0xff]  }
 0x149   :  { %1146 = vmatpush2.bf16.msra.mxu0 %v2464_v47  ;;  %v2557_v47 = vld [vmem:[#allocation5 + $0x1c0] ss:$8 sps:$4 sm:$0xff]  }
 0x14a   :  { %1147 = vmatprep.subr.bf16.mxu0 %v2472_v48  ;;  %1187 = vmatpush2.bf16.msra.mxu1 %v2467_v49  ;;  %v2523_v48 = vld [vmem:[#allocation5 + $0x84] ss:$8 sps:$4 sm:$0xff]   ;;  %v2562_v49 = vld [vmem:[#allocation5 + $0x1b4] ss:$8 sps:$4 sm:$0xff]  }
 0x14b   :  { %1188 = vmatprep.subr.bf16.mxu1 %v2475_v50  ;;  %v2521_v50 = vld [vmem:[#allocation5 + $0x80] ss:$8 sps:$4 sm:$0xff]  }
 0x14d   :  { %1148 = vmatpush2.bf16.msra.mxu0 %v2470_v52  ;;  %v2560_v52 = vld [vmem:[#allocation5 + $0x1b0] ss:$8 sps:$4 sm:$0xff]  }
 0x14e   :  { %1603 = vmatprep.subr.bf16.mxu0 %v2478_v53  ;;  %1189 = vmatpush2.bf16.msra.mxu1 %v2473_v54  ;;  %v2565_v53 = vld [vmem:[#allocation5 + $0x1a4] ss:$8 sps:$4 sm:$0xff]   ;;  %v2563_v54 = vld [vmem:[#allocation5 + $0x1a0] ss:$8 sps:$4 sm:$0xff]  }
 0x14f   :  { %1644 = vmatprep.subr.bf16.mxu1 %v2526_v63 }
 0x150   :  { %1150 = vmatmul.mubr.bf16.vlgmr.msra.gmra.mxu0 %v2821_v46  ;;  %v2488_v46 = vld [vmem:[#allocation5 + $0x30] ss:$8 sps:$4 sm:$0xff]  }
 0x151   :  { %1604 = vmatpush1.bf16.msra.mxu0 %v2476_v55  ;;  %1191 = vmatmul.mubr.bf16.vlgmr.msra.gmra.mxu1 %v2823_v51  ;;  %v2493_v51 = vld [vmem:[#allocation5 + $0x24] ss:$8 sps:$4 sm:$0xff]   ;;  %v2568_v55 = vld [vmem:[#allocation5 + $0x194] ss:$8 sps:$4 sm:$0xff]  }
 0x152   :  { %1605 = vmatprep.subr.bf16.mxu0 %v2481_v56  ;;  %1645 = vmatpush1.bf16.msra.mxu1 %v2524_v0  ;;  %v2566_v56 = vld [vmem:[#allocation5 + $0x190] ss:$8 sps:$4 sm:$0xff]  }
 0x153   :  { %1646 = vmatprep.subr.bf16.mxu1 %v2529_v1 }
 0x155   :  { %1606 = vmatpush1.bf16.msra.mxu0 %v2479_v57  ;;  %v2571_v57 = vld [vmem:[#allocation5 + $0x184] ss:$8 sps:$4 sm:$0xff]  }
 0x156   :  { %1607 = vmatprep.subr.bf16.mxu0 %v2484_v58  ;;  %1647 = vmatpush1.bf16.msra.mxu1 %v2527_v2  ;;  %v2569_v58 = vld [vmem:[#allocation5 + $0x180] ss:$8 sps:$4 sm:$0xff]  }
 0x157   :  { %1648 = vmatprep.subr.bf16.mxu1 %v2532_v3 }
 0x159   :  { %1608 = vmatpush1.bf16.msra.mxu0 %v2482_v59  ;;  %v373_v59 = vld [vmem:[%s2856_s4] sm:$0xf] }
 0x15a   :  { %1609 = vmatprep.subr.bf16.mxu0 %v2487_v60  ;;  %1649 = vmatpush1.bf16.msra.mxu1 %v2530_v6  ;;  %v378_v60 = vrot.slane %v373_v59, %v2805_v20 }
 0x15b   :  { %1650 = vmatprep.subr.bf16.mxu1 %v2535_v8 }
 0x15d   :  { %1610 = vmatpush1.bf16.msra.mxu0 %v2485_v61  ;;  %v382_v61 = vrot.slane %v373_v59, %v2811_v22 }
 0x15e   :  { %1611 = vmatprep.subr.bf16.mxu0 %v2490_v62  ;;  %1651 = vmatpush1.bf16.msra.mxu1 %v2533_v10 }
 0x15f   :  { %1652 = vmatprep.subr.bf16.mxu1 %v2538_v12 }
 0x161   :  { %1612 = vmatpush1.bf16.msra.mxu0 %v2488_v46 }
 0x162   :  { %1613 = vmatprep.subr.bf16.mxu0 %v2493_v51  ;;  %1653 = vmatpush1.bf16.msra.mxu1 %v2536_v14  ;;  %v390_v14 = vrot.slane %v373_v59, %v114_v25  ;;  %v2574_v25 = vld [vmem:[#allocation7 + $0x70] sm:$0xff]  }
 0x163   :  { %1654 = vmatprep.subr.bf16.mxu1 %v2541_v16 }
 0x165   :  { %1614 = vmatpush1.bf16.msra.mxu0 %v2491_v5 }
 0x166   :  { %1615 = vmatprep.subr.bf16.mxu0 %v2496_v7  ;;  %1655 = vmatpush1.bf16.msra.mxu1 %v2539_v18 }
 0x167   :  { %1656 = vmatprep.subr.bf16.mxu1 %v2544_v21 }
 0x169   :  { %1616 = vmatpush1.bf16.msra.mxu0 %v2494_v9 }
 0x16a   :  { %1617 = vmatprep.subr.bf16.mxu0 %v2499_v11  ;;  %1657 = vmatpush1.bf16.msra.mxu1 %v2542_v26 }
 0x16b   :  { %1658 = vmatprep.subr.bf16.mxu1 %v2547_v28 }
 0x16d   :  { %1618 = vmatpush1.bf16.msra.mxu0 %v2497_v13  ;;  %v386_v13 = vrot.slane %v373_v59, %v110_v23  ;;  %v2573_v23 = vld [vmem:[#allocation7 + $0x38] sm:$0xff]  }
 0x16e   :  { %1619 = vmatprep.subr.bf16.mxu0 %v2502_v15  ;;  %1659 = vmatpush1.bf16.msra.mxu1 %v2545_v30 }
 0x16f   :  { %1660 = vmatprep.subr.bf16.mxu1 %v2550_v32 }
 0x171   :  { %1620 = vmatpush2.bf16.msra.mxu0 %v2500_v17 }
 0x172   :  { %1621 = vmatprep.subr.bf16.mxu0 %v2505_v19  ;;  %1661 = vmatpush2.bf16.msra.mxu1 %v2548_v34 }
 0x173   :  { %1662 = vmatprep.subr.bf16.mxu1 %v2553_v36  ;;  %v2576_v36 = vld [vmem:[#allocation7 + $0x68] sm:$0xff]  }
 0x175   :  { %1622 = vmatpush2.bf16.msra.mxu0 %v2503_v24 }
 0x176   :  { %1623 = vmatprep.subr.bf16.mxu0 %v2508_v27  ;;  %1663 = vmatpush2.bf16.msra.mxu1 %v2551_v38  ;;  %v2578_v38 = vld [vmem:[#allocation7 + $0x60] sm:$0xff]  }
 0x177   :  { %1664 = vmatprep.subr.bf16.mxu1 %v2556_v40  ;;  %v2580_v40 = vld [vmem:[#allocation7 + $0x58] sm:$0xff]  }
 0x179   :  { %1624 = vmatpush2.bf16.msra.mxu0 %v2506_v29 }
 0x17a   :  { %1625 = vmatprep.subr.bf16.mxu0 %v2511_v31  ;;  %1665 = vmatpush2.bf16.msra.mxu1 %v2554_v42  ;;  %v2582_v42 = vld [vmem:[#allocation7 + $0x50] sm:$0xff]  }
 0x17b   :  { %1666 = vmatprep.subr.bf16.mxu1 %v2559_v44  ;;  %v2584_v44 = vld [vmem:[#allocation7 + $0x48] sm:$0xff]  }
 0x17d   :  { %1626 = vmatpush2.bf16.msra.mxu0 %v2509_v33 }
 0x17e   :  { %1627 = vmatprep.subr.bf16.mxu0 %v2514_v35  ;;  %1667 = vmatpush2.bf16.msra.mxu1 %v2557_v47  ;;  %v2575_v35 = vld [vmem:[#allocation7 + $0x30] sm:$0xff]   ;;  %v2586_v47 = vld [vmem:[#allocation7 + $0x40] sm:$0xff]  }
 0x17f   :  { %1668 = vmatprep.subr.bf16.mxu1 %v2562_v49  ;;  %v2588_v49 = vld [vmem:[#allocation8 + $0x38] sm:$0xff]  }
 0x181   :  { %1628 = vmatpush2.bf16.msra.mxu0 %v2512_v37  ;;  %v2577_v37 = vld [vmem:[#allocation7 + $0x28] sm:$0xff]  }
 0x182   :  { %1629 = vmatprep.subr.bf16.mxu0 %v2517_v39  ;;  %1669 = vmatpush2.bf16.msra.mxu1 %v2560_v52  ;;  %v2579_v39 = vld [vmem:[#allocation7 + $0x20] sm:$0xff]   ;;  %v2589_v52 = vld [vmem:[#allocation8 + $0x30] sm:$0xff]  }
 0x183   :  { %1670 = vmatprep.subr.bf16.mxu1 %v2565_v53  ;;  %v2590_v53 = vld [vmem:[#allocation8 + $0x28] sm:$0xff]  }
 0x185   :  { %1630 = vmatpush2.bf16.msra.mxu0 %v2515_v41  ;;  %v2581_v41 = vld [vmem:[#allocation7 + $0x18] sm:$0xff]  }
 0x186   :  { %1631 = vmatprep.subr.bf16.mxu0 %v2520_v43  ;;  %1671 = vmatpush2.bf16.msra.mxu1 %v2563_v54  ;;  %v2583_v43 = vld [vmem:[#allocation7 + $0x10] sm:$0xff]   ;;  %v2591_v54 = vld [vmem:[#allocation8 + $0x20] sm:$0xff]  }
 0x187   :  { %1672 = vmatprep.subr.bf16.mxu1 %v2568_v55  ;;  %v2592_v55 = vld [vmem:[#allocation8 + $0x18] sm:$0xff]  }
 0x189   :  { %1632 = vmatpush2.bf16.msra.mxu0 %v2518_v45  ;;  %v2585_v45 = vld [vmem:[#allocation7 + $0x8] sm:$0xff]  }
 0x18a   :  { %1633 = vmatprep.subr.bf16.mxu0 %v2523_v48  ;;  %1673 = vmatpush2.bf16.msra.mxu1 %v2566_v56  ;;  %v2587_v48 = vld [vmem:[#allocation7] sm:$0xff]  }
 0x18b   :  { %1674 = vmatprep.subr.bf16.mxu1 %v2571_v57 }
 0x18d   :  { %1634 = vmatpush2.bf16.msra.mxu0 %v2521_v50  ;;  %v2716_v50 = vmov 0.0  }
 0x18e   :  { %1675 = vmatpush2.bf16.msra.mxu1 %v2569_v58  ;;  %2217 = vmatprep.subr.bf16.mxu0 %v2572_v4 }
 0x18f   :  { %2248 = vmatprep.subr.bf16.mxu1 %v2716_v50 }
 0x1d0   :  { %v1069_v62 = vpop.f32.mrf.mxu0  ;;  %v1110_v1 = vpop.f32.mrf.mxu1 }
 0x1d1   :  { %v1070_v63 = vadd.f32 %v1069_v62, %v378_v60  ;;  %v1271_v60 = vld [vmem:[%s2858_s6] sm:$0x3] }
 0x1d2   :  { %v1071_v0 = vpop.f32.mrf.mxu0  ;;  %v1112_v3 = vpop.f32.mrf.mxu1  ;;  %v1280_v62 = vrot.slane %v1271_v60, %v2811_v22  ;;  %v2595_v22 = vld [vmem:[#allocation8] sm:$0xff]  }
 0x1d3   :  { %v1072_v46 = vadd.f32 %v1071_v0, %v382_v61  ;;  %v1111_v2 = vadd.f32 %v1110_v1, %v1070_v63  ;;  %v1276_v61 = vrot.slane %v1271_v60, %v2805_v20  ;;  %v2594_v20 = vld [vmem:[#allocation8 + $0x8] sm:$0xff]  }
 0x1d4   :  { %v1073_v51 = vpop.f32.mrf.mxu0  ;;  %v1114_v8 = vpop.f32.mrf.mxu1 }
 0x1d5   :  { %v1113_v5 = vadd.f32 %v1112_v3, %v1072_v46  ;;  %v1199_v6 = vmax.f32 %v1111_v2, 0.0 }
 0x1d6   :  { %v1074_v7 = vpop.f32.mrf.mxu0  ;;  %v1115_v10 = vpop.f32.mrf.mxu1 }
 0x1d7   :  { %v1200_v9 = vmax.f32 %v1113_v5, 0.0  ;;  %v1203_v12 = vpack.c.bf16 %v1199_v6, %v1199_v6  ;;  %v2593_v10 = vld [vmem:[#allocation8 + $0x10] sm:$0xff]  }
 0x1d9   :  { %v1204_v11 = vpack.c.bf16 %v1200_v9, %v1200_v9 }
 0x1db   :  { %1635 = vmatprep.mubr.bf16.mxu0 %v1204_v11 }
 0x1dc   :  { %1636 = vmatmul.mubr.bf16.vlgmr.msra.gmra.mxu0 %v1203_v12  ;;  %v2191_v12 = vld [vmem:[%s2860_s8] ss:$0 sm:$0xff]  ;;  %s2676_s8 = scalar_lea.vmem %s1985_s30, 128 }
 0x1dd   :  { %2218 = vmatpush3.bf16.msra.mxu0 %v2573_v23  ;;  %p2677_p6 = scmp.ne.s32.totalorder %s1985_s30, %s2676_s8  ;;  %p2682_p8 = scmp.lt.s32.totalorder %s2676_s8, %s2676_s8 }
 0x1de   :  { %2219 = vmatprep.subr.bf16.mxu0 %v2574_v25 }
 0x1df   :  { %p2683_p9 = por %p2682_p8, %p2681_p7 }
 0x1e1   :  { %2220 = vmatpush3.bf16.msra.mxu0 %v2575_v35  ;;  %p2684_p10 = pnand %p2683_p9, %p2677_p6 }
 0x1e2   :  { %2221 = vmatprep.subr.bf16.mxu0 %v2576_v36 }
 0x1e5   :  { %2222 = vmatpush3.bf16.msra.mxu0 %v2577_v37 }
 0x1e6   :  { %2223 = vmatprep.subr.bf16.mxu0 %v2578_v38 }
 0x1e9   :  { %2224 = vmatpush3.bf16.msra.mxu0 %v2579_v39 }
 0x1ea   :  { %2225 = vmatprep.subr.bf16.mxu0 %v2580_v40 }
 0x1ed   :  { %2226 = vmatpush3.bf16.msra.mxu0 %v2581_v41 }
 0x1ee   :  { %2227 = vmatprep.subr.bf16.mxu0 %v2582_v42 }
 0x1f1   :  { %2228 = vmatpush3.bf16.msra.mxu0 %v2583_v43 }
 0x1f2   :  { %2229 = vmatprep.subr.bf16.mxu0 %v2584_v44 }
 0x1f5   :  { %2230 = vmatpush3.bf16.msra.mxu0 %v2585_v45 }
 0x1f6   :  { %2231 = vmatprep.subr.bf16.mxu0 %v2586_v47 }
 0x1f9   :  { %2232 = vmatpush3.bf16.msra.mxu0 %v2587_v48 }
 0x210   :  { %v1151_v15 = vpop.f32.mrf.mxu0 }
 0x211   :  { %v1152_v16 = vadd.f32 %v1151_v15, %v386_v13  ;;  %v1192_v18 = vpop.f32.mrf.mxu1 }
 0x212   :  { %v1153_v17 = vpop.f32.mrf.mxu0 }
 0x213   :  { %v1154_v19 = vadd.f32 %v1153_v17, %v390_v14  ;;  %v1193_v21 = vadd.f32 %v1192_v18, %v1152_v16  ;;  %v1194_v26 = vpop.f32.mrf.mxu1 }
 0x214   :  { %v1155_v24 = vpop.f32.mrf.mxu0 }
 0x215   :  { %v1195_v27 = vadd.f32 %v1194_v26, %v1154_v19  ;;  %v1201_v28 = vmax.f32 %v1193_v21, 0.0  ;;  %v1196_v30 = vpop.f32.mrf.mxu1  ;;  %v2208_v21 = vld [vmem:[%s2862_s10] ss:$0 sm:$0xff] }
 0x216   :  { %v1156_v29 = vpop.f32.mrf.mxu0 }
 0x217   :  { %v1202_v31 = vmax.f32 %v1195_v27, 0.0  ;;  %v1197_v32 = vpop.f32.mrf.mxu1  ;;  %v1205_v34 = vpack.c.bf16 %v1201_v28, %v1201_v28 }
 0x219   :  { %v1206_v33 = vpack.c.bf16 %v1202_v31, %v1202_v31 }
 0x21b   :  { %1676 = vmatprep.mubr.bf16.mxu1 %v1206_v33 }
 0x21c   :  { %1677 = vmatmul.mubr.bf16.vlgmr.msra.gmra.mxu1 %v1205_v34 }
 0x21d   :  { %2249 = vmatpush3.bf16.msra.mxu1 %v2588_v49  ;;  %2264 = vmatprep.mubr.msk.bf16.mxu1 %vm2717_vm2, %v2716_v50 }
 0x21e   :  { %2250 = vmatprep.subr.bf16.mxu1 %v2716_v50 }
 0x221   :  { %2251 = vmatpush3.bf16.msra.mxu1 %v2589_v52 }
 0x222   :  { %2252 = vmatprep.subr.bf16.mxu1 %v2716_v50 }
 0x225   :  { %2253 = vmatpush3.bf16.msra.mxu1 %v2590_v53 }
 0x226   :  { %2254 = vmatprep.subr.bf16.mxu1 %v2716_v50 }
 0x229   :  { %2255 = vmatpush3.bf16.msra.mxu1 %v2591_v54 }
 0x22a   :  { %2256 = vmatprep.subr.bf16.mxu1 %v2716_v50 }
 0x22d   :  { %2257 = vmatpush3.bf16.msra.mxu1 %v2592_v55 }
 0x22e   :  { %2258 = vmatprep.subr.bf16.mxu1 %v2716_v50 }
 0x231   :  { %2259 = vmatpush3.bf16.msra.mxu1 %v2593_v10 }
 0x232   :  { %2260 = vmatprep.subr.bf16.mxu1 %v2716_v50 }
 0x235   :  { %2261 = vmatpush3.bf16.msra.mxu1 %v2594_v20 }
 0x236   :  { %2262 = vmatprep.subr.bf16.mxu1 %v2716_v50 }
 0x239   :  { %2263 = vmatpush3.bf16.msra.mxu1 %v2595_v22 }
 0x29c   :  { %v1637_v56 = vpop.f32.mrf.mxu0 }
 0x29d   :  { %v1638_v63 = vadd.f32 %v1637_v56, %v1276_v61 }
 0x29e   :  { %v1639_v57 = vpop.f32.mrf.mxu0 }
 0x29f   :  { %v1640_v1 = vadd.f32 %v1639_v57, %v1280_v62 }
 0x2a0   :  { %v1641_v58 = vpop.f32.mrf.mxu0 }
 0x2a2   :  { %v1642_v59 = vpop.f32.mrf.mxu0 }
 0x2dc   :  { %v1678_v0 = vpop.f32.mrf.mxu1 }
 0x2dd   :  { %v1679_v46 = vadd.f32 %v1678_v0, %v1638_v63 }
 0x2de   :  { %v1680_v2 = vpop.f32.mrf.mxu1 }
 0x2df   :  { %v1681_v51 = vadd.f32 %v1680_v2, %v1640_v1  ;;  %v1685_v3 = vmax.f32 %v1679_v46, 0.0 }
 0x2e0   :  { %v1682_v5 = vpop.f32.mrf.mxu1 }
 0x2e1   :  { %v1686_v6 = vmax.f32 %v1681_v51, 0.0  ;;  %v1687_v9 = vpack.c.bf16 %v1685_v3, %v1685_v3 }
 0x2e2   :  { %v1683_v7 = vpop.f32.mrf.mxu1 }
 0x2e3   :  { %v1688_v8 = vpack.c.bf16 %v1686_v6, %v1686_v6 }
 0x2e5   :  { %1856 = vmatprep.mubr.bf16.mxu0 %v1688_v8 }
 0x2e6   :  { %1857 = vmatmul.mubr.bf16.vlgmr.msra.gmra.mxu0 %v1687_v9 }
 0x3a6   :  { %v2233_v11 = vpop.f32.mrf.mxu0 }
 0x3a8   :  { %v2234_v13 = vpop.f32.mrf.mxu0 }
 0x3a9   :  { %v2235_v14 = vadd.f32 %v2234_v13, %v2233_v11 }
 0x3aa   :  { %v2236_v15 = vpop.f32.mrf.mxu0 }
 0x3ab   :  { %v1859_v16 = vadd.f32 %v2235_v14, %v2191_v12 }
 0x3ac   :  { %v2237_v17 = vpop.f32.mrf.mxu0 }
 0x3ad   :  { %v1864_v18 = vmax.f32 %v1859_v16, 0.0 }
 0x3af   :  { %v1865_v19 = vpack.c.bf16 %v1864_v18, %v1864_v18 }
 0x3b1   :  { %2265 = vmatmul.mubr.bf16.vlgmr.msra.gmra.mxu1 %v1865_v19 }
 0x471   :  { %v1971_v24 = vpop.f32.mrf.mxu1 }
 0x472   :  { %v1972_v26 = vadd.f32 %v2208_v21, %v1971_v24 }
 0x473   :  { %v2266_v27 = vpop.f32.mrf.mxu1 }
 0x474   :  { %1977 = vst [vmem:[#allocation10] sm:$0xff] %v1972_v26 }
 0x475   :  { %v1974_v28 = vpop.f32.mrf.mxu1 }
 0x476   :  { %2687 = shalt.err (!%p2684_p10)
}
 0x477   :  { %1987 = dma.vmem_to_hbm [thread:$0]  %s1985_s30, 128, %s2863_s11, [#allocation4]   ;;  %v2267_v29 = vpop.f32.mrf.mxu1 }
 0x478   :  { %2702 = dma.done.wait [#allocation4], 128  }
 0x479   :  { %2703 = vsyncadd [#allocation4], 4294967168 }
 0x47a   :  { %1991 = vsyncpa [#allocation3], 1 }
 0x47b   :  { %1992 = vsyncpa [#allocation6], 1 }
 0x47c   :  { %1993 = vsyncpa [#allocation9], 1 }
 0x47d   :  { %1994 = vsyncpa [#allocation4], 1 }

</bundles_post_ra>
